<compile_context>
chip_gen: v5e
topology: v5e:2x2
jax: 0.10.0
libtpu: 0.0.40
codegen_flags: <defaults>
</compile_context>

<pallas_src>
import jax
import jax.numpy as jnp
from jax.experimental import pallas as pl
from jax.experimental.pallas import tpu as pltpu


_LANES = 512         # lane width of each plane (multiple of 128)
_MAX_BLOCK_R = 1024  # rows per block -> (1024, 512) f32 = 2 MiB per stream


def _round_up(x, m):
    return (x + m - 1) // m * m


def _cprelu_kernel(alpha_ref, xr_ref, xi_ref, or_ref, oi_ref):
    # alpha_ref: (2,) f32 in SMEM -> [slope_real, slope_imag]
    # xr/xi/or/oi: (block_r, _LANES) f32 planes
    a_r = alpha_ref[0]
    a_i = alpha_ref[1]

    xr = xr_ref[...]
    xi = xi_ref[...]

    or_ref[...] = jnp.where(xr >= 0, xr, a_r * xr)
    oi_ref[...] = jnp.where(xi >= 0, xi, a_i * xi)


def complex_prelu(x_complex, alpha_r, alpha_i):
    """x_complex: complex64 (any shape). alpha_r/alpha_i: scalar f32 slopes."""
    orig_shape = x_complex.shape
    total = 1
    for d in orig_shape:
        total *= d

    # Two separate lane-dense planes (no stacked slab materialization).
    xr = jnp.real(x_complex).astype(jnp.float32).reshape(total)
    xi = jnp.imag(x_complex).astype(jnp.float32).reshape(total)

    # Pad only to a whole number of 8-aligned 512-lane rows (<= 8 KiB slack);
    # any ragged final grid block is masked by Pallas.
    rows = _round_up(pl.cdiv(total, _LANES), 8)
    total_p = rows * _LANES
    pad = total_p - total
    if pad:
        xr = jnp.pad(xr, (0, pad))
        xi = jnp.pad(xi, (0, pad))
    xr = xr.reshape(rows, _LANES)
    xi = xi.reshape(rows, _LANES)

    # Row-block: as large as possible (amortize ~0.35 us/step overhead), but
    # guarantee >= 2 grid steps when splittable so v7x can use both TCs.
    block_r = min(_MAX_BLOCK_R, rows)
    if rows > 8 and pl.cdiv(rows, block_r) < 2:
        block_r = _round_up(pl.cdiv(rows, 2), 8)
    grid = (pl.cdiv(rows, block_r),)

    alpha = jnp.stack([
        jnp.asarray(alpha_r, jnp.float32).reshape(()),
        jnp.asarray(alpha_i, jnp.float32).reshape(()),
    ])

    plane_spec = pl.BlockSpec((block_r, _LANES), lambda i: (i, 0))
    out_r, out_i = pl.pallas_call(
        _cprelu_kernel,
        grid=grid,
        out_shape=(
            jax.ShapeDtypeStruct((rows, _LANES), jnp.float32),
            jax.ShapeDtypeStruct((rows, _LANES), jnp.float32),
        ),
        in_specs=[
            pl.BlockSpec(memory_space=pltpu.SMEM),  # slopes
            plane_spec,                             # real plane
            plane_spec,                             # imag plane
        ],
        out_specs=(plane_spec, plane_spec),
        compiler_params=pltpu.CompilerParams(
            dimension_semantics=("parallel",),
            vmem_limit_bytes=32 * 1024 * 1024,
        ),
    )(alpha, xr, xi)

    # Slice off padding and recombine (fuses into one consumer pass).
    out_r = out_r.reshape(total_p)[:total].reshape(orig_shape)
    out_i = out_i.reshape(total_p)[:total].reshape(orig_shape)
    return jax.lax.complex(out_r, out_i)


if __name__ == "__main__":
    key = jax.random.PRNGKey(0)
    kr, ki = jax.random.split(key)

    n, c, h, w = 2, 4, 16, 16  # NCHW
    x_real = jax.random.normal(kr, (n, c, h, w), dtype=jnp.float32)
    x_imag = jax.random.normal(ki, (n, c, h, w), dtype=jnp.float32)
    x = jax.lax.complex(x_real, x_imag)  # complex64

    # PyTorch PReLU() default slope = 0.25.  Passed as traced f32 arrays so
    # changing the slope does not trigger a recompile.
    alpha_r = jnp.asarray(0.25, jnp.float32)
    alpha_i = jnp.asarray(0.25, jnp.float32)

    out = jax.jit(complex_prelu)(x, alpha_r, alpha_i)
    out = jax.block_until_ready(out)

    # Reference check (plain JAX).
    ref_r = jnp.where(x_real >= 0, x_real, alpha_r * x_real)
    ref_i = jnp.where(x_imag >= 0, x_imag, alpha_i * x_imag)
    ref = jax.lax.complex(ref_r, ref_i)

    assert out.shape == (n, c, h, w) and out.dtype == jnp.complex64
    assert jnp.allclose(out, ref, atol=1e-6, rtol=1e-6)

    print("KERNEL_OK")
</pallas_src>

<mosaic_0001>
module attributes {stable_mosaic.version = 11 : i64} {
  func.func @_cprelu_kernel(%arg0: i32, %arg1: memref<2xf32, #tpu.memory_space<smem>>, %arg2: memref<8x512xf32, #tpu.memory_space<vmem>>, %arg3: memref<8x512xf32, #tpu.memory_space<vmem>>, %arg4: memref<8x512xf32, #tpu.memory_space<vmem>>, %arg5: memref<8x512xf32, #tpu.memory_space<vmem>>) attributes {dimension_semantics = [#tpu.dimension_semantics<parallel>], iteration_bounds = array<i64: 1>, scalar_prefetch = 0 : i64, scratch_operands = 0 : i64, tpu.core_type = #tpu.core_type<tc>, window_params = [{transform_indices = @transform_0, window_bounds = array<i64: 2>}, {transform_indices = @transform_1, window_bounds = array<i64: 8, 512>}, {transform_indices = @transform_2, window_bounds = array<i64: 8, 512>}, {transform_indices = @transform_3, window_bounds = array<i64: 8, 512>}, {transform_indices = @transform_4, window_bounds = array<i64: 8, 512>}]} {
    %c0 = arith.constant 0 : index
    %0 = memref.load %arg1[%c0] : memref<2xf32, #tpu.memory_space<smem>>
    %c1 = arith.constant 1 : index
    %1 = memref.load %arg1[%c1] : memref<2xf32, #tpu.memory_space<smem>>
    %c0_0 = arith.constant 0 : index
    %c0_1 = arith.constant 0 : index
    %2 = vector.load %arg2[%c0_0, %c0_1] : memref<8x512xf32, #tpu.memory_space<vmem>>, vector<8x512xf32>
    %c0_2 = arith.constant 0 : index
    %c0_3 = arith.constant 0 : index
    %3 = vector.load %arg3[%c0_2, %c0_3] : memref<8x512xf32, #tpu.memory_space<vmem>>, vector<8x512xf32>
    %cst = arith.constant 0.000000e+00 : f32
    %4 = vector.broadcast %cst : f32 to vector<8x512xf32>
    %5 = arith.cmpf oge, %2, %4 : vector<8x512xf32>
    %6 = vector.broadcast %0 : f32 to vector<8x512xf32>
    %7 = arith.mulf %6, %2 : vector<8x512xf32>
    %8 = arith.select %5, %2, %7 : vector<8x512xi1>, vector<8x512xf32>
    %c0_4 = arith.constant 0 : index
    %c0_5 = arith.constant 0 : index
    %9 = vector.load %arg4[%c0_4, %c0_5] : memref<8x512xf32, #tpu.memory_space<vmem>>, vector<8x512xf32>
    tpu.vector_store %arg4[%c0_4, %c0_5], %8 {strides = array<i32>} : memref<8x512xf32, #tpu.memory_space<vmem>>, vector<8x512xf32>,
    %cst_6 = arith.constant 0.000000e+00 : f32
    %10 = vector.broadcast %cst_6 : f32 to vector<8x512xf32>
    %11 = arith.cmpf oge, %3, %10 : vector<8x512xf32>
    %12 = vector.broadcast %1 : f32 to vector<8x512xf32>
    %13 = arith.mulf %12, %3 : vector<8x512xf32>
    %14 = arith.select %11, %3, %13 : vector<8x512xi1>, vector<8x512xf32>
    %c0_7 = arith.constant 0 : index
    %c0_8 = arith.constant 0 : index
    %15 = vector.load %arg5[%c0_7, %c0_8] : memref<8x512xf32, #tpu.memory_space<vmem>>, vector<8x512xf32>
    tpu.vector_store %arg5[%c0_7, %c0_8], %14 {strides = array<i32>} : memref<8x512xf32, #tpu.memory_space<vmem>>, vector<8x512xf32>,
    return
  }
  func.func @transform_0(%arg0: i32) -> i32 {
    %c0_i32 = arith.constant 0 : i32
    %c0_i32_0 = arith.constant 0 : i32
    return %c0_i32 : i32
  }
  func.func @transform_1(%arg0: i32) -> (i32, i32) {
    %c0_i32 = arith.constant 0 : i32
    %c0_i32_0 = arith.constant 0 : i32
    return %arg0, %c0_i32 : i32, i32
  }
  func.func @transform_2(%arg0: i32) -> (i32, i32) {
    %c0_i32 = arith.constant 0 : i32
    %c0_i32_0 = arith.constant 0 : i32
    return %arg0, %c0_i32 : i32, i32
  }
  func.func @transform_3(%arg0: i32) -> (i32, i32) {
    %c0_i32 = arith.constant 0 : i32
    %c0_i32_0 = arith.constant 0 : i32
    return %arg0, %c0_i32 : i32, i32
  }
  func.func @transform_4(%arg0: i32) -> (i32, i32) {
    %c0_i32 = arith.constant 0 : i32
    %c0_i32_0 = arith.constant 0 : i32
    return %arg0, %c0_i32 : i32, i32
  }
}

</mosaic_0001>

<bundles_post_ra>
// kernel: custom-call.1
= control target key start
LH: loop header
LB: loop body
LE: loop exit
PB: predicated region body
PF: predicated region fallthrough
CT: control target
= control target key end

     0   :  { %s56_s0 = inlined_call_operand.hbm [shape: c64[2,4,16,16], index: 0, kind: input, shape index: {}]   ;;  %s57_s1 = inlined_call_operand.vmem [shape: f32[2,4,16,16], index: 1, kind: output, shape index: {}]  }
   0x1   :  { %s2_s8 = scalar_lea.hbm %s56_s0, 128 }
   0x2   :  { %3 = vsyncpa [#allocation0], 0  ;;  %s5_s9 = sshll.u32 %s2_s8, 4  ;;  %s7_s12 = sshll.u32 %s57_s1, 4  ;;  %s6_s9 = int_to_ptr.hbm [resolvable:$true] %s5_s9  ;;  %s8_s12 = int_to_ptr.vmem [resolvable:$true] %s7_s12 }
   0x3   :  { %10 = dma.hbm_to_vmem [thread:$0]  %s6_s9, 2048, %s8_s12, [#allocation0] }
   0x4   :  { %38 = dma.done.wait [#allocation0], 2048  }
   0x5   :  { %39 = vsyncadd [#allocation0], 4294965248 }
   0x6   :  { %13 = vsyncpa [#allocation0], 1 }

// kernel: custom-call
= control target key start
LH: loop header
LB: loop body
LE: loop exit
PB: predicated region body
PF: predicated region fallthrough
CT: control target
= control target key end

     0   :  { %2 = vsyncpa [#allocation0], 0  ;;  %s55_s0 = inlined_call_operand.hbm [shape: c64[2,4,16,16], index: 0, kind: input, shape index: {}]   ;;  %s56_s1 = inlined_call_operand.vmem [shape: f32[2,4,16,16], index: 1, kind: output, shape index: {}]  }
   0x1   :  { %s4_s8 = sshll.u32 %s55_s0, 4  ;;  %s6_s11 = sshll.u32 %s56_s1, 4  ;;  %s5_s8 = int_to_ptr.hbm [resolvable:$true] %s4_s8  ;;  %s7_s11 = int_to_ptr.vmem [resolvable:$true] %s6_s11 }
   0x2   :  { %9 = dma.hbm_to_vmem [thread:$0]  %s5_s8, 2048, %s7_s11, [#allocation0] }
   0x3   :  { %37 = dma.done.wait [#allocation0], 2048  }
   0x4   :  { %38 = vsyncadd [#allocation0], 4294965248 }
   0x5   :  { %12 = vsyncpa [#allocation0], 1 }

// kernel: custom-call.2
= control target key start
LH: loop header
LB: loop body
LE: loop exit
PB: predicated region body
PF: predicated region fallthrough
CT: control target
= control target key end

     0   :  { %s105_s0 = inlined_call_operand.vmem [shape: f32[2,4,16,16], index: 0, kind: input, shape index: {}]   ;;  %s106_s1 = inlined_call_operand.vmem [shape: f32[2,4,16,16], index: 1, kind: input, shape index: {}]   ;;  %s107_s2 = inlined_call_operand.hbm [shape: c64[2,4,16,16], index: 2, kind: output, shape index: {}]  }
   0x1   :  { %s3_s11 = scalar_lea.hbm %s107_s2, 128 }
   0x2   :  { %4 = vsyncpa [#allocation0], 0  ;;  %s6_s14 = sshll.u32 %s105_s0, 4  ;;  %s8_s17 = sshll.u32 %s107_s2, 4  ;;  %s7_s14 = int_to_ptr.vmem [resolvable:$true] %s6_s14  ;;  %s9_s17 = int_to_ptr.hbm [resolvable:$true] %s8_s17 }
   0x3   :  { %11 = dma.vmem_to_hbm [thread:$0]  %s7_s14, 2048, %s9_s17, [#allocation0] }
   0x4   :  { %74 = dma.done.wait [#allocation0], 2048  }
   0x5   :  { %75 = vsyncadd [#allocation0], 4294965248 }
   0x6   :  { %14 = vsyncpa [#allocation0], 1 }
   0x7   :  { %15 = vsyncpa [#allocation1], 0  ;;  %s17_s20 = sshll.u32 %s106_s1, 4  ;;  %s19_s21 = sshll.u32 %s3_s11, 4  ;;  %s18_s20 = int_to_ptr.vmem [resolvable:$true] %s17_s20  ;;  %s20_s21 = int_to_ptr.hbm [resolvable:$true] %s19_s21 }
   0x8   :  { %22 = dma.vmem_to_hbm [thread:$0]  %s18_s20, 2048, %s20_s21, [#allocation1] }
   0x9   :  { %76 = dma.done.wait [#allocation1], 2048  }
   0xa   :  { %77 = vsyncadd [#allocation1], 4294965248 }
   0xb   :  { %25 = vsyncpa [#allocation1], 1 }

// kernel: complex_prelu.1
= control target key start
LH: loop header
LB: loop body
LE: loop exit
PB: predicated region body
PF: predicated region fallthrough
CT: control target
= control target key end

     0   :  { %10 = vsyncpa [#allocation3], 0  ;;  %s98_s18 = smov [#allocation2]   ;;  %s178_s0 = inlined_call_operand.vmem [shape: f32[2], index: 0, kind: input, shape index: {}]   ;;  %s179_s1 = inlined_call_operand.vmem [shape: f32[8,512], index: 1, kind: input, shape index: {}]   ;;  %s180_s2 = inlined_call_operand.vmem [shape: f32[8,512], index: 2, kind: input, shape index: {}]   ;;  %s181_s3 = inlined_call_operand.vmem [shape: f32[8,512], index: 3, kind: output, shape index: {0}]   ;;  %s182_s4 = inlined_call_operand.vmem [shape: f32[8,512], index: 4, kind: output, shape index: {1}]  }
   0x1   :  { %s16_s17 = sshll.u32 %s178_s0, 4  ;;  %s17_s17 = int_to_ptr.vmem [resolvable:$true] %s16_s17 }
   0x2   :  { %19 = dma.vmem_to_smem %s17_s17, 16, %s98_s18, [#allocation3]  }
   0x3   :  { %96 = dma.done.wait [#allocation3], 16  }
   0x4   :  { %97 = vsyncadd [#allocation3], 4294967280 }
   0x5   :  { %28 = sfence }
   0x6   :  { %s29_s19 = sld [smem:[#allocation2]]  ;;  %v31_v0 = vld [vmem:[%s179_s1] sm:$0xff]  ;;  %v32_v1 = vld [vmem:[%s179_s1 + $0x8] sm:$0xff]  ;;  %v33_v2 = vld [vmem:[%s179_s1 + $0x10] sm:$0xff] }
   0x7   :  { %s82_s20 = sld [smem:[#allocation2 + $0x1]]  ;;  %v34_v3 = vld [vmem:[%s179_s1 + $0x18] sm:$0xff]  ;;  %vm39_vm0 = vcmp.ge.f32.partialorder %v31_v0, 0.0  ;;  %v35_v4 = vld [vmem:[%s180_s2] sm:$0xff]  ;;  %v36_v5 = vld [vmem:[%s180_s2 + $0x8] sm:$0xff]  ;;  %vm40_vm1 = vcmp.ge.f32.partialorder %v32_v1, 0.0 }
   0x8   :  { %v37_v6 = vld [vmem:[%s180_s2 + $0x10] sm:$0xff]  ;;  %vm41_vm2 = vcmp.ge.f32.partialorder %v33_v2, 0.0  ;;  %vm42_vm3 = vcmp.ge.f32.partialorder %v34_v3, 0.0  ;;  %v38_v12 = vld [vmem:[%s180_s2 + $0x18] sm:$0xff]  ;;  %vm56_vm4 = vcmp.ge.f32.partialorder %v35_v4, 0.0  ;;  %vm57_vm5 = vcmp.ge.f32.partialorder %v36_v5, 0.0 }
   0x9   :  { %vm58_vm6 = vcmp.ge.f32.partialorder %v37_v6, 0.0  ;;  %vm59_vm7 = vcmp.ge.f32.partialorder %v38_v12, 0.0 }
   0xc   :  { %v43_v7 = vstv %s29_s19 }
   0xd   :  { %v44_v8 = vmul.f32 %v43_v7, %v31_v0  ;;  %v45_v9 = vmul.f32 %v43_v7, %v32_v1  ;;  %v46_v10 = vmul.f32 %v43_v7, %v33_v2  ;;  %v47_v11 = vmul.f32 %v43_v7, %v34_v3 }
   0xe   :  { %v60_v13 = vstv %s82_s20 }
   0xf   :  { %v48_v14 = vsel %vm39_vm0, %v31_v0, %v44_v8  ;;  %v49_v15 = vsel %vm40_vm1, %v32_v1, %v45_v9  ;;  %v50_v16 = vsel %vm41_vm2, %v33_v2, %v46_v10  ;;  %v51_v17 = vsel %vm42_vm3, %v34_v3, %v47_v11 }
  0x10   :  { %52 = vst [vmem:[%s181_s3] sm:$0xff] %v48_v14  ;;  %v61_v18 = vmul.f32 %v60_v13, %v35_v4  ;;  %v62_v19 = vmul.f32 %v60_v13, %v36_v5  ;;  %v63_v20 = vmul.f32 %v60_v13, %v37_v6  ;;  %v64_v21 = vmul.f32 %v60_v13, %v38_v12 }
  0x11   :  { %53 = vst [vmem:[%s181_s3 + $0x8] sm:$0xff] %v49_v15 }
  0x12   :  { %54 = vst [vmem:[%s181_s3 + $0x10] sm:$0xff] %v50_v16  ;;  %v65_v22 = vsel %vm56_vm4, %v35_v4, %v61_v18  ;;  %v66_v23 = vsel %vm57_vm5, %v36_v5, %v62_v19  ;;  %v67_v24 = vsel %vm58_vm6, %v37_v6, %v63_v20  ;;  %v68_v25 = vsel %vm59_vm7, %v38_v12, %v64_v21 }
  0x13   :  { %55 = vst [vmem:[%s181_s3 + $0x18] sm:$0xff] %v51_v17 }
  0x14   :  { %69 = vst [vmem:[%s182_s4] sm:$0xff] %v65_v22 }
  0x15   :  { %70 = vst [vmem:[%s182_s4 + $0x8] sm:$0xff] %v66_v23 }
  0x16   :  { %71 = vst [vmem:[%s182_s4 + $0x10] sm:$0xff] %v67_v24 }
  0x17   :  { %72 = vst [vmem:[%s182_s4 + $0x18] sm:$0xff] %v68_v25 }
  0x18   :  { %81 = vsyncpa [#allocation3], 1 }

</bundles_post_ra>
